<compile_context>
chip_gen: v6e
topology: v6e:2x2x1
jax: 0.10.0
libtpu: 0.0.40
codegen_flags: <defaults>
</compile_context>

<pallas_src>
import jax
import jax.numpy as jnp
from jax.experimental import pallas as pl
from jax.experimental.pallas import tpu as pltpu


# -----------------------------------------------------------------------------
# Hyper-parameters ("args" from the original repo) -- small synthetic sizes.
# -----------------------------------------------------------------------------
BATCH = 2
REVIEW_COUNT = 3       # args.review_count
REVIEW_LENGTH = 16     # args.review_length
WORD_DIM = 32          # embedding dim
KERNEL_COUNT = 8       # args.kernel_count
KERNEL_SIZE = 3        # args.kernel_size (odd -> "same" conv)
CNN_OUT_DIM = 16       # args.cnn_out_dim
FM_K = 10              # FactorizationMachine latent dim
VOCAB = 50
PAD = (KERNEL_SIZE - 1) // 2

NB = BATCH * REVIEW_COUNT                 # reviews per tower            = 6
FEAT = REVIEW_COUNT * KERNEL_COUNT        # per-tower CNN feature width  = 24
K_IN = KERNEL_SIZE * WORD_DIM             # im2col inner dim             = 96

# -----------------------------------------------------------------------------
# Packed parameter slab layout (f32, one 128-lane tile wide, 8-aligned rows).
# -----------------------------------------------------------------------------
PRM_COLS = 128
ROW_WCONV = 0                       # (K_IN, 2*KERNEL_COUNT)   = (96, 16)
ROW_WH = 96                         # (2*FEAT, 2*CNN_OUT_DIM)  = (48, 32)
ROW_WFM = 144                       # (2*CNN_OUT_DIM, 1+FM_K)  = (32, 11)
ROW_R2 = 176                        # (2*KERNEL_COUNT, 2*FEAT) = (16, 48)
ROW_M = 192                         # (2*NB, 2*FEAT)           = (12, 48)
ROW_SEL = 208                       # (BATCH, 2*NB)            = (2, 12)
ROW_BIAS = 216                      # row: [conv bias(16) | head bias(32) | fm lb(1)]
PRM_ROWS = 224
COL_BH = 2 * KERNEL_COUNT           # 16
COL_LB = COL_BH + 2 * CNN_OUT_DIM   # 48


# -----------------------------------------------------------------------------
# The single fused kernel (conv towers + ReLU + max-pool + heads + FM).
# -----------------------------------------------------------------------------
def deepconn_kernel(act_ref, prm_ref, o_ref):
    f32 = jnp.float32

    # ---- fused user+item Conv1d("same") + bias + ReLU -----------------------
    # act_ref holds pre-built im2col windows for BOTH towers (bf16):
    #   row = tower*96 + review*16 + position, col = tap*WORD_DIM + d.
    w_conv = prm_ref[ROW_WCONV:ROW_WCONV + K_IN, 0:2 * KERNEL_COUNT]   # (96, 16)
    conv = jnp.dot(act_ref[...], w_conv.astype(jnp.bfloat16),
                   preferred_element_type=f32)                          # (192, 16)
    b_conv = prm_ref[ROW_BIAS:ROW_BIAS + 1, 0:2 * KERNEL_COUNT]         # (1, 16)
    conv = jnp.maximum(conv + b_conv, 0.0)

    # ---- per-review max-pool over the 16 token positions --------------------
    pooled = jnp.max(
        conv.reshape(2 * NB, REVIEW_LENGTH, 2 * KERNEL_COUNT), axis=1)  # (12, 16)
    # Dropout after pooling is identity in eval mode.

    # ---- pooled (12, 16) -> feat (2, 48) via static selection matrices ------
    # feat[b, tower*24 + r*8 + c] = pooled[tower*6 + b*3 + r, tower*8 + c]
    r2 = prm_ref[ROW_R2:ROW_R2 + 2 * KERNEL_COUNT, 0:2 * FEAT]          # (16, 48)
    m = prm_ref[ROW_M:ROW_M + 2 * NB, 0:2 * FEAT]                       # (12, 48)
    sel = prm_ref[ROW_SEL:ROW_SEL + BATCH, 0:2 * NB]                    # (2, 12)
    t = jnp.dot(pooled, r2, preferred_element_type=f32)                 # (12, 48)
    feat = jnp.dot(sel, m * t, preferred_element_type=f32)              # (2, 48)

    # ---- both Linear+ReLU heads fused via a block-diagonal weight -----------
    wh = prm_ref[ROW_WH:ROW_WH + 2 * FEAT, 0:2 * CNN_OUT_DIM]           # (48, 32)
    bh = prm_ref[ROW_BIAS:ROW_BIAS + 1, COL_BH:COL_BH + 2 * CNN_OUT_DIM]
    x = jnp.maximum(jnp.dot(feat, wh, preferred_element_type=f32) + bh, 0.0)
    # Dropout after ReLU is identity in eval mode.

    # ---- FactorizationMachine with [linear_w | v] stacked into one weight ---
    wfm = prm_ref[ROW_WFM:ROW_WFM + 2 * CNN_OUT_DIM, 0:1 + FM_K]        # (32, 11)
    lb = prm_ref[ROW_BIAS:ROW_BIAS + 1, COL_LB:COL_LB + 1]              # (1, 1)
    y = jnp.dot(x, wfm, preferred_element_type=f32)                     # (2, 11)
    y2 = jnp.dot(x * x, wfm * wfm, preferred_element_type=f32)          # (2, 11)
    linear_part = y[:, 0:1] + lb
    xv = y[:, 1:]
    pair = jnp.sum(xv * xv - y2[:, 1:], axis=1, keepdims=True)
    # FM dropout on pair_interactions is identity in eval mode.
    o_ref[...] = linear_part + 0.5 * pair


# -----------------------------------------------------------------------------
# Wrapper: embedding gather + im2col window build in XLA, then one pallas_call.
# -----------------------------------------------------------------------------
@jax.jit
def deepconn_forward(user_review, item_review, prep):
    # user_review / item_review: (BATCH, REVIEW_COUNT, REVIEW_LENGTH) int32.
    emb = prep["emb"]

    def im2col(ids):
        vec = jnp.take(emb, ids.reshape(NB, REVIEW_LENGTH), axis=0)     # (6, 16, 32)
        vec = jnp.pad(vec, ((0, 0), (PAD, PAD), (0, 0)))                # (6, 18, 32)
        win = jnp.concatenate(
            [vec[:, k:k + REVIEW_LENGTH, :] for k in range(KERNEL_SIZE)],
            axis=-1)                                                     # (6, 16, 96)
        return win.reshape(NB * REVIEW_LENGTH, K_IN)                     # (96, 96)

    act = jnp.concatenate([im2col(user_review), im2col(item_review)],
                          axis=0).astype(jnp.bfloat16)                   # (192, 96)

    return pl.pallas_call(
        deepconn_kernel,
        out_shape=jax.ShapeDtypeStruct((BATCH, 1), jnp.float32),
        in_specs=[pl.BlockSpec(memory_space=pltpu.MemorySpace.VMEM),
                  pl.BlockSpec(memory_space=pltpu.MemorySpace.VMEM)],
        out_specs=pl.BlockSpec(memory_space=pltpu.MemorySpace.VMEM),
        cost_estimate=pl.CostEstimate(flops=640_000, transcendentals=0,
                                      bytes_accessed=152_000),
    )(act, prep["pslab"])


# -----------------------------------------------------------------------------
# One-time parameter packing (PyTorch layout -> one f32 slab + emb table).
# -----------------------------------------------------------------------------
def prepare_params(p):
    f = jnp.float32
    slab = jnp.zeros((PRM_ROWS, PRM_COLS), f)

    # Fused conv weight: rows = tap*WORD_DIM + d, cols = [user ch | item ch].
    wconv = jnp.concatenate(
        [p["conv_w_u"].reshape(K_IN, KERNEL_COUNT),
         p["conv_w_i"].reshape(K_IN, KERNEL_COUNT)], axis=1)             # (96, 16)
    slab = slab.at[ROW_WCONV:ROW_WCONV + K_IN, 0:2 * KERNEL_COUNT].set(wconv)

    # Block-diagonal fused head weight.
    wh = jnp.zeros((2 * FEAT, 2 * CNN_OUT_DIM), f)
    wh = wh.at[:FEAT, :CNN_OUT_DIM].set(p["wu"])
    wh = wh.at[FEAT:, CNN_OUT_DIM:].set(p["wi"])
    slab = slab.at[ROW_WH:ROW_WH + 2 * FEAT, 0:2 * CNN_OUT_DIM].set(wh)

    # FM weight: [linear_w | v] stacked along lanes.
    lw = jnp.concatenate([p["lwu"], p["lwi"]], axis=0)                   # (32, 1)
    v = jnp.concatenate([p["vu"], p["vi"]], axis=0)                      # (32, K)
    slab = slab.at[ROW_WFM:ROW_WFM + 2 * CNN_OUT_DIM,
                   0:1 + FM_K].set(jnp.concatenate([lw, v], axis=1))

    # Static 0/1 matrices for the pooled (12,16) -> feat (2,48) mapping:
    #   feat = Sel @ (M * (pooled @ R2)).
    j = jnp.arange(2 * FEAT)
    c16 = jnp.arange(2 * KERNEL_COUNT)
    n = jnp.arange(2 * NB)
    r2 = ((c16[:, None] % KERNEL_COUNT == j[None, :] % KERNEL_COUNT)
          & (c16[:, None] // KERNEL_COUNT == j[None, :] // FEAT)).astype(f)
    m = ((n[:, None] // NB == j[None, :] // FEAT)
         & (n[:, None] % REVIEW_COUNT
            == (j[None, :] // KERNEL_COUNT) % REVIEW_COUNT)).astype(f)
    sel = ((n[None, :] % NB) // REVIEW_COUNT
           == jnp.arange(BATCH)[:, None]).astype(f)
    slab = slab.at[ROW_R2:ROW_R2 + 2 * KERNEL_COUNT, 0:2 * FEAT].set(r2)
    slab = slab.at[ROW_M:ROW_M + 2 * NB, 0:2 * FEAT].set(m)
    slab = slab.at[ROW_SEL:ROW_SEL + BATCH, 0:2 * NB].set(sel)

    # Biases in one row: [conv bias(16) | head bias(32) | fm linear bias(1)].
    slab = slab.at[ROW_BIAS, 0:2 * KERNEL_COUNT].set(
        jnp.concatenate([p["conv_b_u"], p["conv_b_i"]], axis=1)[0])
    slab = slab.at[ROW_BIAS, COL_BH:COL_BH + 2 * CNN_OUT_DIM].set(
        jnp.concatenate([p["bu"], p["bi"]], axis=1)[0])
    slab = slab.at[ROW_BIAS, COL_LB].set(p["lb"][0, 0])

    return {"emb": p["word_emb"], "pslab": slab}


# -----------------------------------------------------------------------------
# Pure-JAX reference (f32, same math as the PyTorch module) for a sanity check.
# -----------------------------------------------------------------------------
def reference_forward(user_review, item_review, params):
    nb = user_review.shape[0] * user_review.shape[1]
    emb = params["word_emb"]

    def tower(ids, w, b, lw, lb_):
        vec = emb[ids.reshape(nb, -1)]
        vec = jnp.pad(vec, ((0, 0), (PAD, PAD), (0, 0)))
        acc = jnp.zeros((nb, REVIEW_LENGTH, KERNEL_COUNT), jnp.float32)
        for k in range(KERNEL_SIZE):
            acc += jnp.einsum("nld,dc->nlc",
                              vec[:, k:k + REVIEW_LENGTH, :], w[k])
        acc = jnp.maximum(acc + b, 0.0)
        pooled = jnp.max(acc, axis=1)                        # (NB, C)
        feat = pooled.reshape(BATCH, REVIEW_COUNT * KERNEL_COUNT)
        return jnp.maximum(feat @ lw + lb_, 0.0)

    u_lat = tower(user_review, params["conv_w_u"], params["conv_b_u"],
                  params["wu"], params["bu"])
    i_lat = tower(item_review, params["conv_w_i"], params["conv_b_i"],
                  params["wi"], params["bi"])
    x = jnp.concatenate([u_lat, i_lat], axis=1)
    lw = jnp.concatenate([params["lwu"], params["lwi"]], axis=0)
    v = jnp.concatenate([params["vu"], params["vi"]], axis=0)
    linear_part = x @ lw + params["lb"]
    pair = jnp.sum((x @ v) ** 2 - (x ** 2) @ (v ** 2), axis=1, keepdims=True)
    return linear_part + 0.5 * pair


# -----------------------------------------------------------------------------
# Deterministic parameter init + example inputs.
# -----------------------------------------------------------------------------
def make_params(key):
    ks = jax.random.split(key, 13)
    f = jnp.float32
    return {
        "word_emb": jax.random.normal(ks[0], (VOCAB, WORD_DIM), f) * 0.1,
        # Conv1d weights stored as (K, D, C): w[k, d, c] == torch_w[c, d, k].
        "conv_w_u": jax.random.normal(ks[1], (KERNEL_SIZE, WORD_DIM, KERNEL_COUNT), f) * 0.1,
        "conv_b_u": jax.random.normal(ks[2], (1, KERNEL_COUNT), f) * 0.1,
        "conv_w_i": jax.random.normal(ks[3], (KERNEL_SIZE, WORD_DIM, KERNEL_COUNT), f) * 0.1,
        "conv_b_i": jax.random.normal(ks[4], (1, KERNEL_COUNT), f) * 0.1,
        # CNN linear heads: stored (in, out) so y = x @ w + b.
        "wu": jax.random.normal(ks[5], (FEAT, CNN_OUT_DIM), f) * 0.1,
        "bu": jax.random.normal(ks[6], (1, CNN_OUT_DIM), f) * 0.1,
        "wi": jax.random.normal(ks[7], (FEAT, CNN_OUT_DIM), f) * 0.1,
        "bi": jax.random.normal(ks[8], (1, CNN_OUT_DIM), f) * 0.1,
        # FM parameters, split into user / item halves of the concat axis.
        "lwu": jax.random.normal(ks[9], (CNN_OUT_DIM, 1), f) * 0.1,
        "lwi": jax.random.normal(ks[10], (CNN_OUT_DIM, 1), f) * 0.1,
        "lb": jnp.zeros((1, 1), f),
        "vu": jax.random.uniform(ks[11], (CNN_OUT_DIM, FM_K), f) / 10.0,
        "vi": jax.random.uniform(ks[12], (CNN_OUT_DIM, FM_K), f) / 10.0,
    }


if __name__ == "__main__":
    key = jax.random.PRNGKey(0)
    k_params, k_u, k_i = jax.random.split(key, 3)
    params = make_params(k_params)
    prep = prepare_params(params)

    user_review = jax.random.randint(
        k_u, (BATCH, REVIEW_COUNT, REVIEW_LENGTH), 0, VOCAB, dtype=jnp.int32)
    item_review = jax.random.randint(
        k_i, (BATCH, REVIEW_COUNT, REVIEW_LENGTH), 0, VOCAB, dtype=jnp.int32)

    out = deepconn_forward(user_review, item_review, prep)
    out = jax.block_until_ready(out)

    ref = reference_forward(user_review, item_review, params)
    assert out.shape == (BATCH, 1), out.shape
    # bf16 MXU operands on the conv path (review item 4) relax the tolerance
    # vs. the previous all-f32 1e-4 check; observed errors are ~1e-3.
    assert jnp.allclose(out, ref, atol=1e-2, rtol=1e-2), (out, ref)

    print("KERNEL_OK")
</pallas_src>

<mosaic_0001>
module attributes {stable_mosaic.version = 11 : i64} {
  func.func @deepconn_kernel(%arg0: memref<192x96xbf16, #tpu.memory_space<vmem>>, %arg1: memref<224x128xf32, #tpu.memory_space<vmem>>, %arg2: memref<2x1xf32, #tpu.memory_space<vmem>>) attributes {dimension_semantics = [], scalar_prefetch = 0 : i64, scratch_operands = 0 : i64, tpu.core_type = #tpu.core_type<tc>} {
    %c0 = arith.constant 0 : index
    %c0_0 = arith.constant 0 : index
    %0 = vector.load %arg1[%c0, %c0_0] : memref<224x128xf32, #tpu.memory_space<vmem>>, vector<96x16xf32>
    %c0_1 = arith.constant 0 : index
    %c0_2 = arith.constant 0 : index
    %1 = vector.load %arg0[%c0_1, %c0_2] : memref<192x96xbf16, #tpu.memory_space<vmem>>, vector<192x96xbf16>
    %2 = arith.truncf %0 : vector<96x16xf32> to vector<96x16xbf16>
    %cst = arith.constant dense<0.000000e+00> : vector<192x16xf32>
    %3 = tpu.matmul %1, %2, %cst {dimension_numbers = #tpu.dot_dimension_numbers<[1], [0], [0], [1], [0, 0, 1, 1], [], []>} : vector<192x96xbf16>, vector<96x16xbf16>, vector<192x16xf32> -> vector<192x16xf32>
    %c216 = arith.constant 216 : index
    %c0_3 = arith.constant 0 : index
    %4 = vector.load %arg1[%c216, %c0_3] : memref<224x128xf32, #tpu.memory_space<vmem>>, vector<1x16xf32>
    %5 = vector.broadcast %4 : vector<1x16xf32> to vector<192x16xf32>
    %6 = arith.addf %3, %5 : vector<192x16xf32>
    %cst_4 = arith.constant 0.000000e+00 : f32
    %7 = vector.broadcast %cst_4 : f32 to vector<192x16xf32>
    %8 = arith.maximumf %6, %7 : vector<192x16xf32>
    %9 = vector.shape_cast %8 : vector<192x16xf32> to vector<12x16x16xf32>
    %cst_5 = arith.constant dense<0xFF800000> : vector<12x16xf32>
    %10 = vector.multi_reduction <maximumf>, %9, %cst_5 [1] : vector<12x16x16xf32> to vector<12x16xf32>
    %c176 = arith.constant 176 : index
    %c0_6 = arith.constant 0 : index
    %11 = vector.load %arg1[%c176, %c0_6] : memref<224x128xf32, #tpu.memory_space<vmem>>, vector<16x48xf32>
    %c192 = arith.constant 192 : index
    %c0_7 = arith.constant 0 : index
    %12 = vector.load %arg1[%c192, %c0_7] : memref<224x128xf32, #tpu.memory_space<vmem>>, vector<12x48xf32>
    %c208 = arith.constant 208 : index
    %c0_8 = arith.constant 0 : index
    %13 = vector.load %arg1[%c208, %c0_8] : memref<224x128xf32, #tpu.memory_space<vmem>>, vector<2x12xf32>
    %cst_9 = arith.constant dense<0.000000e+00> : vector<12x48xf32>
    %14 = tpu.matmul %10, %11, %cst_9 {dimension_numbers = #tpu.dot_dimension_numbers<[1], [0], [0], [1], [0, 0, 1, 1], [], []>} : vector<12x16xf32>, vector<16x48xf32>, vector<12x48xf32> -> vector<12x48xf32>
    %15 = arith.mulf %12, %14 : vector<12x48xf32>
    %cst_10 = arith.constant dense<0.000000e+00> : vector<2x48xf32>
    %16 = tpu.matmul %13, %15, %cst_10 {dimension_numbers = #tpu.dot_dimension_numbers<[1], [0], [0], [1], [0, 0, 1, 1], [], []>} : vector<2x12xf32>, vector<12x48xf32>, vector<2x48xf32> -> vector<2x48xf32>
    %c96 = arith.constant 96 : index
    %c0_11 = arith.constant 0 : index
    %17 = vector.load %arg1[%c96, %c0_11] : memref<224x128xf32, #tpu.memory_space<vmem>>, vector<48x32xf32>
    %c216_12 = arith.constant 216 : index
    %c16 = arith.constant 16 : index
    %18 = vector.load %arg1[%c216_12, %c16] : memref<224x128xf32, #tpu.memory_space<vmem>>, vector<1x32xf32>
    %cst_13 = arith.constant dense<0.000000e+00> : vector<2x32xf32>
    %19 = tpu.matmul %16, %17, %cst_13 {dimension_numbers = #tpu.dot_dimension_numbers<[1], [0], [0], [1], [0, 0, 1, 1], [], []>} : vector<2x48xf32>, vector<48x32xf32>, vector<2x32xf32> -> vector<2x32xf32>
    %20 = vector.broadcast %18 : vector<1x32xf32> to vector<2x32xf32>
    %21 = arith.addf %19, %20 : vector<2x32xf32>
    %cst_14 = arith.constant 0.000000e+00 : f32
    %22 = vector.broadcast %cst_14 : f32 to vector<2x32xf32>
    %23 = arith.maximumf %21, %22 : vector<2x32xf32>
    %c144 = arith.constant 144 : index
    %c0_15 = arith.constant 0 : index
    %24 = vector.load %arg1[%c144, %c0_15] : memref<224x128xf32, #tpu.memory_space<vmem>>, vector<32x11xf32>
    %c216_16 = arith.constant 216 : index
    %c48 = arith.constant 48 : index
    %25 = vector.load %arg1[%c216_16, %c48] : memref<224x128xf32, #tpu.memory_space<vmem>>, vector<1x1xf32>
    %cst_17 = arith.constant dense<0.000000e+00> : vector<2x11xf32>
    %26 = tpu.matmul %23, %24, %cst_17 {dimension_numbers = #tpu.dot_dimension_numbers<[1], [0], [0], [1], [0, 0, 1, 1], [], []>} : vector<2x32xf32>, vector<32x11xf32>, vector<2x11xf32> -> vector<2x11xf32>
    %27 = arith.mulf %23, %23 : vector<2x32xf32>
    %28 = arith.mulf %24, %24 : vector<32x11xf32>
    %cst_18 = arith.constant dense<0.000000e+00> : vector<2x11xf32>
    %29 = tpu.matmul %27, %28, %cst_18 {dimension_numbers = #tpu.dot_dimension_numbers<[1], [0], [0], [1], [0, 0, 1, 1], [], []>} : vector<2x32xf32>, vector<32x11xf32>, vector<2x11xf32> -> vector<2x11xf32>
    %30 = vector.extract_strided_slice %26 {offsets = [0, 0], sizes = [2, 1], strides = [1, 1]} : vector<2x11xf32> to vector<2x1xf32>
    %31 = vector.broadcast %25 : vector<1x1xf32> to vector<2x1xf32>
    %32 = arith.addf %30, %31 : vector<2x1xf32>
    %33 = vector.extract_strided_slice %26 {offsets = [0, 1], sizes = [2, 10], strides = [1, 1]} : vector<2x11xf32> to vector<2x10xf32>
    %34 = arith.mulf %33, %33 : vector<2x10xf32>
    %35 = vector.extract_strided_slice %29 {offsets = [0, 1], sizes = [2, 10], strides = [1, 1]} : vector<2x11xf32> to vector<2x10xf32>
    %36 = arith.subf %34, %35 : vector<2x10xf32>
    %cst_19 = arith.constant dense<0.000000e+00> : vector<2xf32>
    %37 = vector.multi_reduction <add>, %36, %cst_19 [1] : vector<2x10xf32> to vector<2xf32>
    %38 = vector.shape_cast %37 : vector<2xf32> to vector<2x1xf32>
    %cst_20 = arith.constant 5.000000e-01 : f32
    %39 = vector.broadcast %cst_20 : f32 to vector<2x1xf32>
    %40 = arith.mulf %39, %38 : vector<2x1xf32>
    %41 = arith.addf %32, %40 : vector<2x1xf32>
    %c0_21 = arith.constant 0 : index
    %c0_22 = arith.constant 0 : index
    %42 = vector.load %arg2[%c0_21, %c0_22] : memref<2x1xf32, #tpu.memory_space<vmem>>, vector<2x1xf32>
    tpu.vector_store %arg2[%c0_21, %c0_22], %41 {strides = array<i32>} : memref<2x1xf32, #tpu.memory_space<vmem>>, vector<2x1xf32>,
    return
  }
}

</mosaic_0001>

<bundles_post_ra>
// kernel: deepconn_forward.1
= control target key start
LH: loop header
LB: loop body
LE: loop exit
PB: predicated region body
PF: predicated region fallthrough
CT: control target
= control target key end

     0   :  { %vm119_vm0 = vcmask 785408   ;;  %vm309_vm1 = vcmask 130048   ;;  %vm435_vm2 = vcmask 1041409   ;;  %vm437_vm3 = vcmask 1042434   ;;  %s1054_s24 = smov 112   ;;  %s1056_s5 = smov 80   ;;  %s1293_s1 = inlined_call_operand.vmem [shape: f32[224,128], index: 1, kind: input, shape index: {}]   ;;  %s1294_s0 = inlined_call_operand.vmem [shape: bf16[192,96], index: 0, kind: input, shape index: {}]   ;;  %s1295_s2 = inlined_call_operand.vmem [shape: f32[2,1], index: 2, kind: output, shape index: {}]  }
   0x1   :  { %v22_v0 = vld [vmem:[%s1293_s1 + $0x50] sm:$0xff]  ;;  %v23_v1 = vld [vmem:[%s1293_s1 + $0x58] sm:$0xff]  ;;  %v20_v2 = vld [vmem:[%s1293_s1 + $0x40] sm:$0xff]  ;;  %vm439_vm4 = vcmask 1043459   ;;  %vm441_vm5 = vcmask 1044484   ;;  %vm443_vm6 = vcmask 1045509  }
   0x2   :  { %v53_v3 = vpack.c.bf16 %v23_v1, %v22_v0  ;;  %v21_v4 = vld [vmem:[%s1293_s1 + $0x48] sm:$0xff]  ;;  %v18_v6 = vld [vmem:[%s1293_s1 + $0x30] sm:$0xff]  ;;  %v19_v7 = vld [vmem:[%s1293_s1 + $0x38] sm:$0xff]  ;;  %vm445_vm7 = vcmask 1046534   ;;  %vm447_vm8 = vcmask 1047559   ;;  %vm1053_vm9 = vmmov 0  }
   0x3   :  { %v52_v5 = vpack.c.bf16 %v21_v4, %v20_v2  ;;  %v1040_v8 = vld [vmem:[%s1294_s0] sm:$0xff]   ;;  %v51_v9 = vpack.c.bf16 %v19_v7, %v18_v6  ;;  %v17_v11 = vld [vmem:[%s1293_s1 + $0x28] sm:$0xff]  ;;  %v14_v13 = vld [vmem:[%s1293_s1 + $0x10] sm:$0xff]  ;;  %vm537_vm10 = vcmask 1043456   ;;  %vm533_vm11 = vcmask 97280  }
   0x4   :  { %948 = vmatprep.subr.bf16.mxu0 %v53_v3  ;;  %v16_v10 = vld [vmem:[%s1293_s1 + $0x20] sm:$0xff]  ;;  %960 = vmatprep.mubr.msk.bf16.mxu0 %vm119_vm0, %v1040_v8  ;;  %v15_v14 = vld [vmem:[%s1293_s1 + $0x18] sm:$0xff]  ;;  %v13_v17 = vld [vmem:[%s1293_s1 + $0x8] sm:$0xff]  ;;  %vm621_vm12 = vcmask 392192   ;;  %vm700_vm13 = vcmask 261120   ;;  %vm862_vm14 = vcmask 74752  }
   0x5   :  { %949 = vmatpush3.bf16.msra.mxu0 %v53_v3  ;;  %v50_v12 = vpack.c.bf16 %v17_v11, %v16_v10  ;;  %v49_v15 = vpack.c.bf16 %v15_v14, %v14_v13  ;;  %v12_v16 = vld [vmem:[%s1293_s1] sm:$0xff]  ;;  %v1041_v19 = vld [vmem:[%s1294_s0 + $0x8] sm:$0xff]   ;;  %v1042_v20 = vld [vmem:[%s1294_s0 + $0x10] sm:$0xff]   ;;  %vm868_vm15 = vcmask 1024  }
   0x6   :  { %950 = vmatprep.subr.bf16.mxu0 %v52_v5  ;;  %v48_v18 = vpack.c.bf16 %v13_v17, %v12_v16  ;;  %v1043_v21 = vld [vmem:[%s1294_s0 + $0x18] sm:$0xff]   ;;  %v1044_v22 = vld [vmem:[%s1294_s0 + $0x20] sm:$0xff]   ;;  %v1045_v23 = vld [vmem:[%s1294_s0 + $0x28] sm:$0xff]  }
   0x7   :  { %v1046_v24 = vld [vmem:[%s1294_s0 + $0x30] sm:$0xff]   ;;  %v1047_v25 = vld [vmem:[%s1294_s0 + $0x38] sm:$0xff]   ;;  %v1048_v26 = vld [vmem:[%s1294_s0 + $0x40] sm:$0xff]  }
   0x8   :  { %v1049_v27 = vld [vmem:[%s1294_s0 + $0x48] sm:$0xff]   ;;  %v1050_v28 = vld [vmem:[%s1294_s0 + $0x50] sm:$0xff]   ;;  %v1051_v29 = vld [vmem:[%s1294_s0 + $0x58] sm:$0xff]  }
   0x9   :  { %951 = vmatpush3.bf16.msra.mxu0 %v52_v5  ;;  %v419_v30 = vld [vmem:[%s1293_s1 + $0xb8] sm:$0xff]  ;;  %v418_v31 = vld [vmem:[%s1293_s1 + $0xb0] sm:$0xff] }
   0xa   :  { %952 = vmatprep.subr.bf16.mxu0 %v51_v9  ;;  %984 = vmatprep.subr.mxu1 %v419_v30  ;;  %v1165_v32 = vld [vmem:[%s1293_s1 + $0xd8] ss:$0 sm:$0xff] }
   0xb   :  { %985 = vmatpush3.msra.mxu1 %v419_v30  ;;  %618 = vrot.lane.b32.xlu0 %v1165_v32, %s1054_s24 }
   0xc   :  { %986 = vmatprep.subr.mxu1 %v418_v31 }
   0xd   :  { %953 = vmatpush3.bf16.msra.mxu0 %v51_v9  ;;  %987 = vmatpush3.msra.mxu1 %v418_v31 }
   0xe   :  { %954 = vmatprep.subr.bf16.mxu0 %v50_v12 }
  0x11   :  { %955 = vmatpush3.bf16.msra.mxu0 %v50_v12 }
  0x12   :  { %956 = vmatprep.subr.bf16.mxu0 %v49_v15 }
  0x15   :  { %957 = vmatpush3.bf16.msra.mxu0 %v49_v15 }
  0x16   :  { %958 = vmatprep.subr.bf16.mxu0 %v48_v18 }
  0x19   :  { %959 = vmatpush3.bf16.msra.mxu0 %v48_v18 }
  0x1c   :  { %961 = vmatmul.mubr.msk.bf16.vlgmr.msra.gmra.mxu0 %vm119_vm0, %v1041_v19 }
  0x1d   :  { %964 = vmatprep.mubr.msk.bf16.mxu0 %vm119_vm0, %v1042_v20 }
  0x24   :  { %965 = vmatmul.mubr.msk.bf16.gmra.mxu0 %vm119_vm0, %v1043_v21 }
  0x25   :  { %968 = vmatprep.mubr.msk.bf16.mxu0 %vm119_vm0, %v1044_v22 }
  0x2c   :  { %969 = vmatmul.mubr.msk.bf16.gmra.mxu0 %vm119_vm0, %v1045_v23 }
  0x2d   :  { %972 = vmatprep.mubr.msk.bf16.mxu0 %vm119_vm0, %v1046_v24 }
  0x34   :  { %973 = vmatmul.mubr.msk.bf16.gmra.mxu0 %vm119_vm0, %v1047_v25 }
  0x35   :  { %976 = vmatprep.mubr.msk.bf16.mxu0 %vm119_vm0, %v1048_v26 }
  0x3c   :  { %977 = vmatmul.mubr.msk.bf16.gmra.mxu0 %vm119_vm0, %v1049_v27 }
  0x3d   :  { %980 = vmatprep.mubr.msk.bf16.mxu0 %vm119_vm0, %v1050_v28 }
  0x44   :  { %981 = vmatmul.mubr.msk.bf16.gmra.mxu0 %vm119_vm0, %v1051_v29 }
  0xdc   :  { %v962_v33 = vpop.f32.mrf.mxu0 }
  0xdd   :  { %v199_v34 = vadd.f32 %v962_v33, %v1165_v32 }
  0xde   :  { %v190_v35 = vpop.f32.mrf.mxu0 }
  0xdf   :  { %v191_v36 = vadd.f32 %v1165_v32, %v190_v35  ;;  %v287_v38 = vmax.f32 %v199_v34, 0.0 }
  0xe0   :  { %v963_v37 = vpop.f32.mrf.mxu0 }
  0xe1   :  { %v202_v39 = vadd.f32 %v963_v37, %v1165_v32  ;;  %v285_v41 = vmax.f32 %v191_v36, 0.0  ;;  %v319_v45 = vsel %vm309_vm1, %v287_v38, -inf }
  0xe2   :  { %v193_v40 = vpop.f32.mrf.mxu0 }
  0xe3   :  { %v288_v42 = vmax.f32 %v202_v39, 0.0  ;;  %v194_v43 = vadd.f32 %v1165_v32, %v193_v40  ;;  %v310_v51 = vsel %vm309_vm1, %v285_v41, -inf }
  0xe4   :  { %v966_v44 = vpop.f32.mrf.mxu0 }
  0xe5   :  { %v320_v46 = vsel %vm309_vm1, %v288_v42, -inf  ;;  %v286_v47 = vmax.f32 %v194_v43, 0.0  ;;  %v215_v48 = vadd.f32 %v966_v44, %v1165_v32 }
  0xe6   :  { %v321_v49 = vmax.f32 %v319_v45, %v320_v46  ;;  %v206_v50 = vpop.f32.mrf.mxu0 }
  0xe7   :  { %v311_v52 = vsel %vm309_vm1, %v286_v47, -inf  ;;  %v207_v53 = vadd.f32 %v1165_v32, %v206_v50  ;;  %v291_v57 = vmax.f32 %v215_v48, 0.0 }
  0xe8   :  { %v322_v54 = vrot.slane %v321_v49, 4  ;;  %v312_v55 = vmax.f32 %v310_v51, %v311_v52  ;;  %v967_v56 = vpop.f32.mrf.mxu0 }
  0xe9   :  { %v218_v58 = vadd.f32 %v967_v56, %v1165_v32  ;;  %v289_v62 = vmax.f32 %v207_v53, 0.0  ;;  %v337_v3 = vsel %vm309_vm1, %v291_v57, -inf }
  0xea   :  { %v313_v59 = vrot.slane %v312_v55, 4  ;;  %v209_v60 = vpop.f32.mrf.mxu0  ;;  %v323_v61 = vmax.f32 %v321_v49, %v322_v54 }
  0xeb   :  { %v292_v63 = vmax.f32 %v218_v58, 0.0  ;;  %v210_v0 = vadd.f32 %v1165_v32, %v209_v60  ;;  %v328_v10 = vsel %vm309_vm1, %v289_v62, -inf }
  0xec   :  { %v314_v1 = vmax.f32 %v312_v55, %v313_v59  ;;  %v970_v2 = vpop.f32.mrf.mxu0  ;;  %v324_v9 = vrot.slane %v323_v61, 2 }
  0xed   :  { %v338_v4 = vsel %vm309_vm1, %v292_v63, -inf  ;;  %v290_v5 = vmax.f32 %v210_v0, 0.0  ;;  %v231_v6 = vadd.f32 %v970_v2, %v1165_v32 }
  0xee   :  { %v339_v7 = vmax.f32 %v337_v3, %v338_v4  ;;  %v222_v8 = vpop.f32.mrf.mxu0  ;;  %v315_v13 = vrot.slane %v314_v1, 2  ;;  %v325_v22 = vmax.f32 %v323_v61, %v324_v9 }
  0xef   :  { %v329_v11 = vsel %vm309_vm1, %v290_v5, -inf  ;;  %v223_v12 = vadd.f32 %v1165_v32, %v222_v8  ;;  %v295_v17 = vmax.f32 %v231_v6, 0.0 }
  0xf0   :  { %v340_v14 = vrot.slane %v339_v7, 4  ;;  %v330_v15 = vmax.f32 %v328_v10, %v329_v11  ;;  %v971_v16 = vpop.f32.mrf.mxu0  ;;  %v316_v26 = vmax.f32 %v314_v1, %v315_v13  ;;  %v326_v38 = vrot.slane %v325_v22, 1 }
  0xf1   :  { %v234_v18 = vadd.f32 %v971_v16, %v1165_v32  ;;  %v293_v23 = vmax.f32 %v223_v12, 0.0  ;;  %v355_v29 = vsel %vm309_vm1, %v295_v17, -inf }
  0xf2   :  { %v341_v19 = vmax.f32 %v339_v7, %v340_v14  ;;  %v331_v20 = vrot.slane %v330_v15, 4  ;;  %v225_v21 = vpop.f32.mrf.mxu0  ;;  %v317_v42 = vrot.slane %v316_v26, 1  ;;  %v327_v57 = vmax.f32 %v325_v22, %v326_v38 }
  0xf3   :  { %v296_v24 = vmax.f32 %v234_v18, 0.0  ;;  %v226_v25 = vadd.f32 %v1165_v32, %v225_v21  ;;  %v346_v39 = vsel %vm309_vm1, %v293_v23, -inf }
  0xf4   :  { %v332_v27 = vmax.f32 %v330_v15, %v331_v20  ;;  %v974_v28 = vpop.f32.mrf.mxu0  ;;  %v342_v34 = vrot.slane %v341_v19, 2  ;;  %v318_v58 = vmax.f32 %v316_v26, %v317_v42 }
  0xf5   :  { %v356_v30 = vsel %vm309_vm1, %v296_v24, -inf  ;;  %v294_v31 = vmax.f32 %v226_v25, 0.0  ;;  %v247_v33 = vadd.f32 %v974_v28, %v1165_v32 }
  0xf6   :  { %v333_v35 = vrot.slane %v332_v27, 2  ;;  %v357_v36 = vmax.f32 %v355_v29, %v356_v30  ;;  %v238_v37 = vpop.f32.mrf.mxu0  ;;  %v343_v49 = vmax.f32 %v341_v19, %v342_v34  ;;  %v436_v16 = vsel %vm435_vm2, %v327_v57, %v318_v58 }
  0xf7   :  { %v347_v40 = vsel %vm309_vm1, %v294_v31, -inf  ;;  %v239_v41 = vadd.f32 %v1165_v32, %v238_v37  ;;  %v299_v47 = vmax.f32 %v247_v33, 0.0 }
  0xf8   :  { %v334_v43 = vmax.f32 %v332_v27, %v333_v35  ;;  %v358_v44 = vrot.slane %v357_v36, 4  ;;  %v348_v45 = vmax.f32 %v346_v39, %v347_v40  ;;  %v975_v46 = vpop.f32.mrf.mxu0  ;;  %v344_v1 = vrot.slane %v343_v49, 1 }
  0xf9   :  { %v250_v48 = vadd.f32 %v975_v46, %v1165_v32  ;;  %v297_v54 = vmax.f32 %v239_v41, 0.0  ;;  %v373_v61 = vsel %vm309_vm1, %v299_v47, -inf }
  0xfa   :  { %v359_v50 = vmax.f32 %v357_v36, %v358_v44  ;;  %v349_v51 = vrot.slane %v348_v45, 4  ;;  %v241_v52 = vpop.f32.mrf.mxu0  ;;  %v335_v53 = vrot.slane %v334_v43, 1  ;;  %v345_v22 = vmax.f32 %v343_v49, %v344_v1 }
  0xfb   :  { %v300_v55 = vmax.f32 %v250_v48, 0.0  ;;  %v242_v56 = vadd.f32 %v1165_v32, %v241_v52  ;;  %v364_v7 = vsel %vm309_vm1, %v297_v54, -inf }
  0xfc   :  { %v350_v59 = vmax.f32 %v348_v45, %v349_v51  ;;  %v978_v60 = vpop.f32.mrf.mxu0  ;;  %v360_v2 = vrot.slane %v359_v50, 2  ;;  %v336_v6 = vmax.f32 %v334_v43, %v335_v53 }
  0xfd   :  { %v374_v62 = vsel %vm309_vm1, %v300_v55, -inf  ;;  %v298_v63 = vmax.f32 %v242_v56, 0.0  ;;  %v263_v0 = vadd.f32 %v978_v60, %v1165_v32 }
  0xfe   :  { %v351_v3 = vrot.slane %v350_v59, 2  ;;  %v375_v4 = vmax.f32 %v373_v61, %v374_v62  ;;  %v254_v5 = vpop.f32.mrf.mxu0  ;;  %v361_v17 = vmax.f32 %v359_v50, %v360_v2  ;;  %v438_v30 = vsel %vm437_vm3, %v336_v6, %v436_v16 }
  0xff   :  { %v365_v8 = vsel %vm309_vm1, %v298_v63, -inf  ;;  %v255_v9 = vadd.f32 %v1165_v32, %v254_v5  ;;  %v303_v13 = vmax.f32 %v263_v0, 0.0  ;;  %v440_v48 = vsel %vm439_vm4, %v345_v22, %v438_v30 }
 0x100   :  { %v352_v10 = vmax.f32 %v350_v59, %v351_v3  ;;  %v376_v11 = vrot.slane %v375_v4, 4  ;;  %v366_v12 = vmax.f32 %v364_v7, %v365_v8  ;;  %v979_v14 = vpop.f32.mrf.mxu0  ;;  %v362_v36 = vrot.slane %v361_v17, 1 }
 0x101   :  { %v266_v15 = vadd.f32 %v979_v14, %v1165_v32  ;;  %v301_v23 = vmax.f32 %v255_v9, 0.0  ;;  %v391_v28 = vsel %vm309_vm1, %v303_v13, -inf }
 0x102   :  { %v353_v18 = vrot.slane %v352_v10, 1  ;;  %v377_v19 = vmax.f32 %v375_v4, %v376_v11  ;;  %v367_v20 = vrot.slane %v366_v12, 4  ;;  %v257_v21 = vpop.f32.mrf.mxu0  ;;  %v363_v55 = vmax.f32 %v361_v17, %v362_v36 }
 0x103   :  { %v304_v24 = vmax.f32 %v266_v15, 0.0  ;;  %v258_v25 = vadd.f32 %v1165_v32, %v257_v21  ;;  %v382_v41 = vsel %vm309_vm1, %v301_v23, -inf }
 0x104   :  { %v378_v26 = vrot.slane %v377_v19, 2  ;;  %v368_v27 = vmax.f32 %v366_v12, %v367_v20  ;;  %v982_v29 = vpop.f32.mrf.mxu0  ;;  %v354_v31 = vmax.f32 %v352_v10, %v353_v18 }
 0x105   :  { %v392_v33 = vsel %vm309_vm1, %v304_v24, -inf  ;;  %v302_v34 = vmax.f32 %v258_v25, 0.0  ;;  %v279_v35 = vadd.f32 %v982_v29, %v1165_v32 }
 0x106   :  { %v369_v37 = vrot.slane %v368_v27, 2  ;;  %v393_v38 = vmax.f32 %v391_v28, %v392_v33  ;;  %v270_v39 = vpop.f32.mrf.mxu0  ;;  %v379_v40 = vmax.f32 %v377_v19, %v378_v26  ;;  %v442_v52 = vsel %vm441_vm5, %v354_v31, %v440_v48  ;;  %v699_v48 = vld [vmem:[%s1293_s1 + $0xa8] sm:$0xff] }
 0x107   :  { %v383_v42 = vsel %vm309_vm1, %v302_v34, -inf  ;;  %v271_v43 = vadd.f32 %v1165_v32, %v270_v39  ;;  %v307_v49 = vmax.f32 %v279_v35, 0.0  ;;  %v444_v63 = vsel %vm443_vm6, %v363_v55, %v442_v52  ;;  %v421_v35 = vld [vmem:[%s1293_s1 + $0xc8] sm:$0xf]  ;;  %v697_v52 = vld [vmem:[%s1293_s1 + $0x98] sm:$0xff] }
 0x108   :  { %v370_v44 = vmax.f32 %v368_v27, %v369_v37  ;;  %v394_v45 = vrot.slane %v393_v38, 4  ;;  %v384_v46 = vmax.f32 %v382_v41, %v383_v42  ;;  %v983_v47 = vpop.f32.mrf.mxu0  ;;  %v380_v51 = vrot.slane %v379_v40, 1  ;;  %v420_v37 = vld [vmem:[%s1293_s1 + $0xc0] sm:$0xff]  ;;  %v422_v41 = vld [vmem:[%s1293_s1 + $0xd0] sm:$0x3]  ;;  %v616_v42 = vld [vmem:[%s1293_s1 + $0x88] sm:$0xff] }
 0x109   :  { %v282_v50 = vadd.f32 %v983_v47, %v1165_v32  ;;  %v305_v58 = vmax.f32 %v271_v43, 0.0  ;;  %v409_v0 = vsel %vm309_vm1, %v307_v49, -inf  ;;  %v1052_v34 = vmov 0.0   ;;  %v615_v43 = vld [vmem:[%s1293_s1 + $0x80] sm:$0xff] }
 0x10a   :  { %v385_v53 = vrot.slane %v384_v46, 4  ;;  %v273_v54 = vpop.f32.mrf.mxu0  ;;  %v371_v56 = vrot.slane %v370_v44, 1  ;;  %v395_v57 = vmax.f32 %v393_v38, %v394_v45  ;;  %v381_v3 = vmax.f32 %v379_v40, %v380_v51  ;;  %991 = vmatprep.subr.mxu1 %v1052_v34  ;;  %v613_v45 = vld [vmem:[%s1293_s1 + $0x70] sm:$0xff]  ;;  %v611_v47 = vld [vmem:[%s1293_s1 + $0x60] sm:$0xff] }
 0x10b   :  { %v308_v59 = vmax.f32 %v282_v50, 0.0  ;;  %v274_v60 = vadd.f32 %v1165_v32, %v273_v54  ;;  %v400_v8 = vsel %vm309_vm1, %v305_v58, -inf  ;;  %v698_v50 = vld [vmem:[%s1293_s1 + $0xa0] sm:$0xff]  ;;  %v619_v54 = vpop.permute.xlu0 %618 }
 0x10c   :  { %v386_v61 = vmax.f32 %v384_v46, %v385_v53  ;;  %v372_v62 = vmax.f32 %v370_v44, %v371_v56  ;;  %v396_v7 = vrot.slane %v395_v57, 2  ;;  %v614_v44 = vld [vmem:[%s1293_s1 + $0x78] sm:$0xff]  ;;  %v612_v46 = vld [vmem:[%s1293_s1 + $0x68] sm:$0xff]  ;;  %v696_v53 = vld [vmem:[%s1293_s1 + $0x90] sm:$0xff]  ;;  %s1055_s1 = smov 127  }
 0x10d   :  { %v410_v1 = vsel %vm309_vm1, %v308_v59, -inf  ;;  %v306_v2 = vmax.f32 %v274_v60, 0.0  ;;  %v777_v60 = vmul.f32 %v698_v50, %v698_v50 }
 0x10e   :  { %v387_v4 = vrot.slane %v386_v61, 2  ;;  %v411_v5 = vmax.f32 %v409_v0, %v410_v1  ;;  %v446_v6 = vsel %vm445_vm7, %v372_v62, %v444_v63  ;;  %v397_v16 = vmax.f32 %v395_v57, %v396_v7 }
 0x10f   :  { %v401_v9 = vsel %vm309_vm1, %v306_v2, -inf  ;;  %v448_v10 = vsel %vm447_vm8, %v381_v3, %v446_v6  ;;  %v778_v57 = vmul.f32 %v699_v48, %v699_v48  ;;  %v775_v62 = vmul.f32 %v696_v53, %v696_v53 }
 0x110   :  { %v412_v11 = vrot.slane %v411_v5, 4  ;;  %v402_v12 = vmax.f32 %v400_v8, %v401_v9  ;;  %988 = vmatprep.mubr.msk.f32.mxu1 %vm309_vm1, %v448_v10  ;;  %v388_v13 = vmax.f32 %v386_v61, %v387_v4  ;;  %v398_v22 = vrot.slane %v397_v16, 1 }
 0x111   :  { %v776_v61 = vmul.f32 %v697_v52, %v697_v52 }
 0x112   :  { %v413_v14 = vmax.f32 %v411_v5, %v412_v11  ;;  %v403_v15 = vrot.slane %v402_v12, 4  ;;  %v389_v19 = vrot.slane %v388_v13, 1  ;;  %v399_v27 = vmax.f32 %v397_v16, %v398_v22 }
 0x114   :  { %v414_v17 = vrot.slane %v413_v14, 2  ;;  %v404_v18 = vmax.f32 %v402_v12, %v403_v15  ;;  %v390_v24 = vmax.f32 %v388_v13, %v389_v19 }
 0x116   :  { %v415_v20 = vmax.f32 %v413_v14, %v414_v17  ;;  %v405_v21 = vrot.slane %v404_v18, 2  ;;  %v449_v30 = vsel %vm435_vm2, %v399_v27, %v390_v24 }
 0x118   :  { %v406_v23 = vmax.f32 %v404_v18, %v405_v21  ;;  %v416_v25 = vrot.slane %v415_v20, 1 }
 0x11a   :  { %v407_v26 = vrot.slane %v406_v23, 1  ;;  %v417_v29 = vmax.f32 %v415_v20, %v416_v25 }
 0x11c   :  { %v408_v28 = vmax.f32 %v406_v23, %v407_v26 }
 0x11e   :  { %v450_v31 = vsel %vm437_vm3, %v408_v28, %v449_v30 }
 0x11f   :  { %v451_v33 = vsel %vm439_vm4, %v417_v29, %v450_v31 }
 0x120   :  { %989 = vmatmul.mubr.msk.f32.vlgmr.msra.gmra.mxu1 %vm309_vm1, %v451_v33 }
 0x121   :  { %995 = vmatprep.mubr.msk.f32.mxu1 %vm1053_vm9, %v1052_v34 }
 0x1e0   :  { %v990_v36 = vpop.f32.mrf.mxu1 }
 0x1e1   :  { %v532_v38 = vmul.f32 %v990_v36, %v421_v35 }
 0x1e2   :  { %v522_v39 = vpop.f32.mrf.mxu1 }
 0x1e3   :  { %v531_v40 = vmul.f32 %v522_v39, %v420_v37  ;;  %992 = vmatpush3.msk.msra.mxu1 %vm537_vm10, %v532_v38 }
 0x1e4   :  { %993 = vmatprep.subr.mxu1 %v1052_v34 }
 0x1e5   :  { %994 = vmatpush3.msra.mxu1 %v531_v40 }
 0x1e6   :  { %996 = vmatmul.mubr.msk.f32.vlgmr.msra.gmra.mxu1 %vm533_vm11, %v422_v41  ;;  %998 = vmatprep.subr.mxu1 %v1052_v34 }
 0x1e7   :  { %999 = vmatpush3.msra.mxu1 %v616_v42  ;;  %1010 = vmatprep.mubr.msk.f32.mxu1 %vm1053_vm9, %v1052_v34 }
 0x1e8   :  { %1000 = vmatprep.subr.mxu1 %v1052_v34 }
 0x1e9   :  { %1001 = vmatpush3.msra.mxu1 %v615_v43 }
 0x1ea   :  { %1002 = vmatprep.subr.mxu1 %v1052_v34 }
 0x1eb   :  { %1003 = vmatpush3.msra.mxu1 %v614_v44 }
 0x1ec   :  { %1004 = vmatprep.subr.mxu1 %v1052_v34 }
 0x1ed   :  { %1005 = vmatpush3.msra.mxu1 %v613_v45 }
 0x1ee   :  { %1006 = vmatprep.subr.mxu1 %v1052_v34 }
 0x1ef   :  { %1007 = vmatpush3.msra.mxu1 %v612_v46 }
 0x1f0   :  { %1008 = vmatprep.subr.mxu1 %v1052_v34 }
 0x1f1   :  { %1009 = vmatpush3.msra.mxu1 %v611_v47 }
 0x1f2   :  { %1013 = vmatprep.subr.mxu1 %v1052_v34 }
 0x2a6   :  { %v607_v49 = vpop.f32.mrf.mxu1 }
 0x2a7   :  { %1011 = vmatmul.mubr.msk.f32.vlgmr.msra.gmra.mxu1 %vm621_vm12, %v607_v49 }
 0x2a8   :  { %v997_v51 = vpop.f32.mrf.mxu1  ;;  %1014 = vmatpush3.msra.mxu1 %v699_v48  ;;  %1021 = vmatprep.mubr.msk.f32.mxu1 %vm1053_vm9, %v1052_v34 }
 0x2a9   :  { %1015 = vmatprep.subr.mxu1 %v1052_v34 }
 0x2aa   :  { %1016 = vmatpush3.msra.mxu1 %v698_v50 }
 0x2ab   :  { %1017 = vmatprep.subr.mxu1 %v1052_v34 }
 0x2ac   :  { %1018 = vmatpush3.msra.mxu1 %v697_v52 }
 0x2ad   :  { %1019 = vmatprep.subr.mxu1 %v1052_v34 }
 0x2ae   :  { %1020 = vmatpush3.msra.mxu1 %v696_v53 }
 0x2af   :  { %1024 = vmatprep.subr.mxu1 %v1052_v34 }
 0x367   :  { %v691_v55 = vpop.f32.mrf.mxu1 }
 0x368   :  { %v692_v56 = vadd.f32 %v691_v55, %v619_v54 }
 0x369   :  { %v1012_v58 = vpop.f32.mrf.mxu1 }
 0x36a   :  { %v695_v59 = vmax.f32 %v692_v56, 0.0 }
 0x36c   :  { %1022 = vmatmul.mubr.msk.f32.vlgmr.msra.gmra.mxu1 %vm700_vm13, %v695_v59  ;;  %v774_v63 = vmul.f32 %v695_v59, %v695_v59 }
 0x36d   :  { %1025 = vmatpush3.msra.mxu1 %v778_v57  ;;  %1032 = vmatprep.mubr.msk.f32.mxu1 %vm1053_vm9, %v1052_v34 }
 0x36e   :  { %1026 = vmatprep.subr.mxu1 %v1052_v34 }
 0x36f   :  { %1027 = vmatpush3.msra.mxu1 %v777_v60 }
 0x370   :  { %1028 = vmatprep.subr.mxu1 %v1052_v34 }
 0x371   :  { %1029 = vmatpush3.msra.mxu1 %v776_v61 }
 0x372   :  { %1030 = vmatprep.subr.mxu1 %v1052_v34 }
 0x373   :  { %1031 = vmatpush3.msra.mxu1 %v775_v62 }
 0x374   :  { %1033 = vmatmul.mubr.msk.f32.vlgmr.msra.gmra.mxu1 %vm700_vm13, %v774_v63 }
 0x42c   :  { %v770_v0 = vpop.f32.mrf.mxu1 }
 0x42d   :  { %v856_v2 = vmul.f32 %v770_v0, %v770_v0 }
 0x42e   :  { %v1023_v1 = vpop.f32.mrf.mxu1 }
 0x434   :  { %v848_v3 = vpop.f32.mrf.mxu1 }
 0x435   :  { %v857_v4 = vsub.f32 %v856_v2, %v848_v3 }
 0x436   :  { %v1034_v5 = vpop.f32.mrf.mxu1 }
 0x437   :  { %859 = vrot.lane.b32.xlu0 %v857_v4, %s1055_s1 }
 0x4a9   :  { %v860_v6 = vpop.permute.xlu0 %859 }
 0x4aa   :  { %v863_v7 = vsel %vm862_vm14, %v860_v6, 0.0 }
 0x4ab   :  { %864 = vadd.xlane.f32.xlu1 %v863_v7 }
 0x4bc   :  { %852 = vrot.lane.b32.xlu1 %v1165_v32, %s1056_s5 }
 0x534   :  { %v865_v8 = vpop.xlane.xlu1 %864 }
 0x535   :  { %v866_v10 = vmul.f32 0.5, %v865_v8 }
 0x538   :  { %v853_v9 = vpop.permute.xlu1 %852 }
 0x539   :  { %v855_v11 = vadd.f32 %v853_v9, %v770_v0 }
 0x53b   :  { %v867_v12 = vadd.f32 %v866_v10, %v855_v11 }
 0x53d   :  { %869 = vst.msk [vmem:[%s1295_s2] sm:$0x3] %vm868_vm15, %v867_v12 }

</bundles_post_ra>
